<compile_context>
chip_gen: v6e
topology: v6e:2x2x1
jax: 0.10.0
libtpu: 0.0.40
codegen_flags: <defaults>
</compile_context>

<pallas_src>
import jax
import jax.numpy as jnp
import numpy as np
from jax.experimental import pallas as pl
from jax.experimental.pallas import tpu as pltpu


def _mfm32_kernel(x_ref, o_ref):
    # x_ref block: (TN, 3, ...) ;  o_ref block: (TN, 2, ...).
    # Works for both the 4-D (TN, 3, TG, TL) and flattened 3-D (TN, 3, TM) paths.
    a = x_ref[:, 0]
    b = x_ref[:, 1]
    c = x_ref[:, 2]
    hi = jnp.maximum(a, b)
    lo = jnp.minimum(a, b)
    o_ref[:, 0] = jnp.maximum(hi, c)                    # largest of the 3
    o_ref[:, 1] = jnp.maximum(lo, jnp.minimum(hi, c))   # 2nd-largest (exact)


def _round_up(x, m):
    return (x + m - 1) // m * m


def _choose_tiles_4d(N, G, L, itemsize, budget):
    """Tile (N, 3, G, L) into blocks (TN, 3, TG, TL) within a VMEM budget.

    Footprint per buffer = (3 in + 2 out) rows, sublane/lane padded, times 2
    for the default double-buffered pipeline.  Prefers TG == G (then folds
    whole images, TN > 1, for one big contiguous DMA per step), then the
    largest dtype-aligned TG, then an L tile as a last resort.
    """
    sub = max(8, 32 // itemsize)            # 8 (f32) / 16 (bf16) / 32 (int8)
    row_bytes = 2 * 5 * _round_up(L, 128) * itemsize      # per padded G-row
    max_rows = budget // row_bytes
    if max_rows >= _round_up(G, sub):
        slab = row_bytes * _round_up(G, sub)               # one whole image
        tn = min(N, max(1, budget // slab))
        return tn, G, L
    if max_rows >= sub:
        tg = (max_rows // sub) * sub                       # <= G by construction
        return 1, tg, L
    # Huge L with tiny budget: tile the lane axis too (multiples of 128).
    tg = min(sub, G)
    col_bytes = 2 * 5 * _round_up(tg, sub) * 128 * itemsize
    tl = max(128, (budget // col_bytes) * 128)
    tl = min(tl, L)
    return 1, tg, tl


def _choose_tiles_flat(N, M, itemsize, budget):
    """Tile (N, 3, M) into blocks (TN, 3, TM), TM a multiple of 128 (or full M).

    The 3-row / 2-row sublane dims pad to a full 32-byte sublane stack, so the
    per-128-lane footprint is dtype independent: 2 * (32 + 32) * 128 bytes.
    """
    del itemsize
    col_bytes = 2 * (32 + 32) * 128
    max_cols = max(budget // col_bytes, 1)
    m_cols = pl.cdiv(M, 128)
    if max_cols >= m_cols:
        slab = col_bytes * m_cols
        tn = min(N, max(1, budget // slab))
        return tn, M
    return 1, max_cols * 128


def max_feature_map32(x, *, vmem_budget_bytes=12 * 1024 * 1024):
    """x: (N, C, H, W) with C % 3 == 0.  Returns (N, 2*C//3, H, W)."""
    N, C, H, W = x.shape
    assert C % 3 == 0
    G = C // 3
    L = H * W
    itemsize = x.dtype.itemsize

    # Explicit scoped-VMEM limit = buffer budget + headroom for Pallas internal
    # scratch/semaphores.  Default budget (12 MiB) -> 20 MiB limit: safe on
    # v5e/v6e (128 MiB physical) and v7x (64 MiB physical, 32 MiB default).
    vmem_limit = vmem_budget_bytes + (8 << 20)

    if L % 128 == 0:
        # Lane-dense as-is: keep (G, L) as the (sublane, lane) dims.
        xr = x.reshape(N, 3, G, L)                 # free: splits a major dim
        tn, tg, tl = _choose_tiles_4d(N, G, L, itemsize, vmem_budget_bytes)
        grid = (pl.cdiv(N, tn), pl.cdiv(G, tg), pl.cdiv(L, tl))
        out = pl.pallas_call(
            _mfm32_kernel,
            out_shape=jax.ShapeDtypeStruct((N, 2, G, L), x.dtype),
            grid=grid,
            in_specs=[pl.BlockSpec((tn, 3, tg, tl), lambda n, g, l: (n, 0, g, l))],
            out_specs=pl.BlockSpec((tn, 2, tg, tl), lambda n, g, l: (n, 0, g, l)),
            compiler_params=pltpu.CompilerParams(
                dimension_semantics=("parallel", "parallel", "parallel"),
                vmem_limit_bytes=vmem_limit),
        )(xr)
    else:
        # H*W not a multiple of 128 (7x7, 8x8, 14x14 maps): flatten (G, H, W)
        # into one lane axis so almost every store is an unmasked full-width vst.
        M = G * L
        xr = x.reshape(N, 3, M)
        tn, tm = _choose_tiles_flat(N, M, itemsize, vmem_budget_bytes)
        grid = (pl.cdiv(N, tn), pl.cdiv(M, tm))
        out = pl.pallas_call(
            _mfm32_kernel,
            out_shape=jax.ShapeDtypeStruct((N, 2, M), x.dtype),
            grid=grid,
            in_specs=[pl.BlockSpec((tn, 3, tm), lambda n, m: (n, 0, m))],
            out_specs=pl.BlockSpec((tn, 2, tm), lambda n, m: (n, 0, m)),
            compiler_params=pltpu.CompilerParams(
                dimension_semantics=("parallel", "parallel"),
                vmem_limit_bytes=vmem_limit),
        )(xr)

    # (N, 2, G, L/M) -> (N, 2G, H, W): merges leading dims only, so
    # out[:, :G] = max and out[:, G:] = 2nd-largest, matching the PyTorch module.
    return out.reshape(N, 2 * G, H, W)


def _reference(x):
    """Pure-JAX reference mirroring the PyTorch module exactly."""
    N, C, H, W = x.shape
    G = C // 3
    stacked = jnp.stack([x[:, :G], x[:, G:2 * G], x[:, 2 * G:]], axis=1)  # (N,3,G,H,W)
    top2 = -jnp.sort(-stacked, axis=1)[:, :2]                             # (N,2,G,H,W)
    return jnp.concatenate([top2[:, 0], top2[:, 1]], axis=1)              # (N,2G,H,W)


if __name__ == "__main__":
    k0, k1 = jax.random.split(jax.random.PRNGKey(0))

    # Primary test: units=12 channels, 16x16 maps (L=256 -> lane-dense 4-D path).
    x = jax.random.normal(k0, (2, 12, 16, 16), dtype=jnp.float32)
    out = jax.block_until_ready(max_feature_map32(x))
    ref = jax.block_until_ready(_reference(x))
    assert out.shape == (2, 8, 16, 16), out.shape
    np.testing.assert_allclose(np.asarray(out), np.asarray(ref), rtol=1e-6, atol=1e-6)

    # Secondary test: 7x7 maps (L=49, not a multiple of 128 -> flattened path).
    x2 = jax.random.normal(k1, (2, 12, 7, 7), dtype=jnp.float32)
    out2 = jax.block_until_ready(max_feature_map32(x2))
    ref2 = jax.block_until_ready(_reference(x2))
    assert out2.shape == (2, 8, 7, 7), out2.shape
    np.testing.assert_allclose(np.asarray(out2), np.asarray(ref2), rtol=1e-6, atol=1e-6)

    print("KERNEL_OK")
</pallas_src>

<mosaic_0001>
module attributes {stable_mosaic.version = 11 : i64} {
  func.func @_mfm32_kernel(%arg0: i32, %arg1: i32, %arg2: i32, %arg3: memref<2x3x4x256xf32, #tpu.memory_space<vmem>>, %arg4: memref<2x2x4x256xf32, #tpu.memory_space<vmem>>) attributes {dimension_semantics = [#tpu.dimension_semantics<parallel>, #tpu.dimension_semantics<parallel>, #tpu.dimension_semantics<parallel>], iteration_bounds = array<i64: 1, 1, 1>, scalar_prefetch = 0 : i64, scratch_operands = 0 : i64, tpu.core_type = #tpu.core_type<tc>, window_params = [{transform_indices = @transform_0, window_bounds = array<i64: 2, 3, 4, 256>}, {transform_indices = @transform_1, window_bounds = array<i64: 2, 2, 4, 256>}]} {
    %c0 = arith.constant 0 : index
    %c0_0 = arith.constant 0 : index
    %c0_1 = arith.constant 0 : index
    %c0_2 = arith.constant 0 : index
    %0 = vector.load %arg3[%c0, %c0_0, %c0_1, %c0_2] : memref<2x3x4x256xf32, #tpu.memory_space<vmem>>, vector<2x1x4x256xf32>
    %1 = vector.shape_cast %0 : vector<2x1x4x256xf32> to vector<2x4x256xf32>
    %c0_3 = arith.constant 0 : index
    %c1 = arith.constant 1 : index
    %c0_4 = arith.constant 0 : index
    %c0_5 = arith.constant 0 : index
    %2 = vector.load %arg3[%c0_3, %c1, %c0_4, %c0_5] : memref<2x3x4x256xf32, #tpu.memory_space<vmem>>, vector<2x1x4x256xf32>
    %3 = vector.shape_cast %2 : vector<2x1x4x256xf32> to vector<2x4x256xf32>
    %c0_6 = arith.constant 0 : index
    %c2 = arith.constant 2 : index
    %c0_7 = arith.constant 0 : index
    %c0_8 = arith.constant 0 : index
    %4 = vector.load %arg3[%c0_6, %c2, %c0_7, %c0_8] : memref<2x3x4x256xf32, #tpu.memory_space<vmem>>, vector<2x1x4x256xf32>
    %5 = vector.shape_cast %4 : vector<2x1x4x256xf32> to vector<2x4x256xf32>
    %6 = arith.maximumf %1, %3 : vector<2x4x256xf32>
    %7 = arith.minimumf %1, %3 : vector<2x4x256xf32>
    %8 = arith.maximumf %6, %5 : vector<2x4x256xf32>
    %c0_9 = arith.constant 0 : index
    %c0_10 = arith.constant 0 : index
    %c0_11 = arith.constant 0 : index
    %c0_12 = arith.constant 0 : index
    %9 = vector.load %arg4[%c0_9, %c0_10, %c0_11, %c0_12] : memref<2x2x4x256xf32, #tpu.memory_space<vmem>>, vector<2x1x4x256xf32>
    %10 = vector.shape_cast %9 : vector<2x1x4x256xf32> to vector<2x4x256xf32>
    %11 = vector.shape_cast %8 : vector<2x4x256xf32> to vector<2x1x4x256xf32>
    tpu.vector_store %arg4[%c0_9, %c0_10, %c0_11, %c0_12], %11 {strides = array<i32>} : memref<2x2x4x256xf32, #tpu.memory_space<vmem>>, vector<2x1x4x256xf32>,
    %12 = arith.minimumf %6, %5 : vector<2x4x256xf32>
    %13 = arith.maximumf %7, %12 : vector<2x4x256xf32>
    %c0_13 = arith.constant 0 : index
    %c1_14 = arith.constant 1 : index
    %c0_15 = arith.constant 0 : index
    %c0_16 = arith.constant 0 : index
    %14 = vector.load %arg4[%c0_13, %c1_14, %c0_15, %c0_16] : memref<2x2x4x256xf32, #tpu.memory_space<vmem>>, vector<2x1x4x256xf32>
    %15 = vector.shape_cast %14 : vector<2x1x4x256xf32> to vector<2x4x256xf32>
    %16 = vector.shape_cast %13 : vector<2x4x256xf32> to vector<2x1x4x256xf32>
    tpu.vector_store %arg4[%c0_13, %c1_14, %c0_15, %c0_16], %16 {strides = array<i32>} : memref<2x2x4x256xf32, #tpu.memory_space<vmem>>, vector<2x1x4x256xf32>,
    return
  }
  func.func @transform_0(%arg0: i32, %arg1: i32, %arg2: i32) -> (i32, i32, i32, i32) {
    %c0_i32 = arith.constant 0 : i32
    %c0_i32_0 = arith.constant 0 : i32
    return %arg0, %c0_i32, %arg1, %arg2 : i32, i32, i32, i32
  }
  func.func @transform_1(%arg0: i32, %arg1: i32, %arg2: i32) -> (i32, i32, i32, i32) {
    %c0_i32 = arith.constant 0 : i32
    %c0_i32_0 = arith.constant 0 : i32
    return %arg0, %c0_i32, %arg1, %arg2 : i32, i32, i32, i32
  }
}

</mosaic_0001>

<bundles_post_ra>
// kernel: tpu_custom_call.1
= control target key start
LH: loop header
LB: loop body
LE: loop exit
PB: predicated region body
PF: predicated region fallthrough
CT: control target
= control target key end

     0   :  { %6 = vsyncpa [#allocation3], 0  ;;  %s137_s0 = inlined_call_operand.hbm [shape: f32[2,3,4,256], index: 0, kind: input, shape index: {}]   ;;  %s138_s1 = inlined_call_operand.hbm [shape: f32[2,2,4,256], index: 1, kind: output, shape index: {}]  }
   0x1   :  { %7 = vsyncpa [#allocation4], 0  ;;  %s111_s6 = smov [#allocation2]  }
   0x2   :  { %s13_s7 = sshll.u32 %s111_s6, 4  ;;  %s14_s7 = int_to_ptr.vmem [resolvable:$true] %s13_s7 }
   0x3   :  { %s75_s8 = scalar_lea.vmem %s14_s7, 768  ;;  %p80_p1 = scmp.lt.s32.totalorder %s14_s7, %s14_s7 }
   0x4   :  { %p76_p0 = scmp.ne.s32.totalorder %s14_s7, %s75_s8  ;;  %p81_p2 = scmp.lt.s32.totalorder %s75_s8, %s75_s8 }
   0x6   :  { %p82_p3 = por %p81_p2, %p80_p1 }
   0x8   :  { %p83_p4 = pnand %p82_p3, %p76_p0 }
   0xa   :  { %86 = shalt.err (!%p83_p4)
}
   0xb   :  { %s112_s9 = smov 128   ;;  %s113_s10 = smov 8  }
   0xc   :  { %19 = dma.hbm_to_vmem [thread:$0]  %s137_s0, 768, %s14_s7, [#allocation3], %s112_s9, %s112_s9, %s113_s10  }
   0xd   :  { %107 = dma.done.wait [#allocation3], 768  }
   0xe   :  { %108 = vsyncadd [#allocation3], 4294966528  ;;  %v23_v0 = vld [vmem:[#allocation2] sm:$0xff]  ;;  %v26_v1 = vld [vmem:[#allocation2 + $0x8] sm:$0xff]  ;;  %s114_s13 = smov [#allocation5]  }
   0xf   :  { %v29_v2 = vld [vmem:[#allocation2 + $0x10] sm:$0xff]  ;;  %v31_v3 = vmax.f32 %v23_v0, %v26_v1  ;;  %v24_v4 = vld [vmem:[#allocation2 + $0x18] sm:$0xff]  ;;  %v27_v5 = vld [vmem:[#allocation2 + $0x20] sm:$0xff]  ;;  %v33_v7 = vmin.f32 %v23_v0, %v26_v1  ;;  %s51_s14 = sshll.u32 %s114_s13, 4  ;;  %s52_s14 = int_to_ptr.vmem [resolvable:$true] %s51_s14 }
  0x10   :  { %v30_v6 = vld [vmem:[#allocation2 + $0x28] sm:$0xff]  ;;  %v32_v8 = vmax.f32 %v24_v4, %v27_v5  ;;  %v34_v9 = vmin.f32 %v24_v4, %v27_v5  ;;  %s87_s0 = scalar_lea.vmem %s52_s14, 512  ;;  %p92_p6 = scmp.lt.s32.totalorder %s52_s14, %s52_s14 }
  0x11   :  { %v35_v10 = vmax.f32 %v31_v3, %v29_v2  ;;  %v39_v11 = vmin.f32 %v31_v3, %v29_v2  ;;  %p88_p5 = scmp.ne.s32.totalorder %s52_s14, %s87_s0  ;;  %p93_p7 = scmp.lt.s32.totalorder %s87_s0, %s87_s0 }
  0x12   :  { %v36_v12 = vmax.f32 %v32_v8, %v30_v6  ;;  %v40_v13 = vmin.f32 %v32_v8, %v30_v6 }
  0x13   :  { %37 = vst [vmem:[#allocation5] sm:$0xff] %v35_v10  ;;  %v41_v14 = vmax.f32 %v33_v7, %v39_v11  ;;  %p94_p8 = por %p93_p7, %p92_p6 }
  0x14   :  { %38 = vst [vmem:[#allocation5 + $0x10] sm:$0xff] %v36_v12  ;;  %v42_v15 = vmax.f32 %v34_v9, %v40_v13 }
  0x15   :  { %44 = vst [vmem:[#allocation5 + $0x8] sm:$0xff] %v41_v14  ;;  %p95_p9 = pnand %p94_p8, %p88_p5 }
  0x16   :  { %45 = vst [vmem:[#allocation5 + $0x18] sm:$0xff] %v42_v15 }
  0x17   :  { %98 = shalt.err (!%p95_p9)
}
  0x18   :  { %57 = dma.vmem_to_hbm [thread:$0]  %s52_s14, 512, %s138_s1, [#allocation4], %s112_s9, %s112_s9, %s113_s10  }
  0x19   :  { %109 = dma.done.wait [#allocation4], 512  }
  0x1a   :  { %110 = vsyncadd [#allocation4], 4294966784 }
  0x1b   :  { %61 = vsyncpa [#allocation3], 1 }
  0x1c   :  { %62 = vsyncpa [#allocation4], 1 }

</bundles_post_ra>
